<compile_context>
chip_gen: v7x
topology: tpu7x:2x2x1
jax: 0.10.0
libtpu: 0.0.40
codegen_flags: <defaults>
</compile_context>

<pallas_src>
import jax
import jax.numpy as jnp
from jax.experimental import pallas as pl
from jax.experimental.pallas import tpu as pltpu

_LANES = 128


def _fused_kernel(params_ref, x_ref, o_ref):
    # params_ref : SMEM (C_in + 1,) f32 scalar-prefetch == [scale_0..scale_{C-1}, offset]
    # x_ref      : VMEM (1, C_in, TR, L)  raw image tile (values in [0, 255], any dtype)
    # o_ref      : VMEM (1, TR, L)        sigmoid of channel-0 logits
    c_in = x_ref.shape[1]
    acc = x_ref[0, 0].astype(jnp.float32) * params_ref[0] + params_ref[c_in]
    for c in range(1, c_in):                      # unrolled per-channel FMA (VPU)
        acc = acc + x_ref[0, c].astype(jnp.float32) * params_ref[c]
    o_ref[0] = jax.nn.sigmoid(acc).astype(o_ref.dtype)   # exp/recip on the EUP slot


def _round_up(v, m):
    return ((v + m - 1) // m) * m


def _pick_tile(total, target, sub, batch):
    """Sublane tile size: multiple of `sub` (or == total), capped by `target`.
    If batch == 1 and one step would cover everything, split in two so a v7x
    megacore gets >= 2 grid steps (harmless on single-TC v5e/v6e)."""
    t = max((min(target, max(total, 1)) // sub) * sub, sub)
    if t >= total:
        t = total
        if batch == 1 and total >= 2 * sub:
            half = _round_up((total + 1) // 2, sub)
            if half < total:
                t = half
    assert t == total or t % sub == 0
    return t


def model_wrapper_line_segmentation(x, mean, std, w, b, *, tile_rows=1024,
                                    out_dtype=jnp.float32):
    """x: (B, C_in, H, W), float32 or uint8, values in [0, 255]. Returns (1, B, H, W)."""
    B, C, H, W = x.shape

    # ---- host-side folding of normalization + channel-0 row of the 1x1 conv ----
    w0 = w[0].astype(jnp.float32)                          # (C,)
    std_f = std.astype(jnp.float32)
    scale = w0 / (255.0 * std_f)                           # (C,)
    offset = b[0].astype(jnp.float32) - jnp.sum(w0 * mean.astype(jnp.float32) / std_f)
    params = jnp.concatenate([scale, jnp.reshape(offset, (1,))])        # (C + 1,) f32

    # sublane granularity for the input dtype (u8 packs 4x along sublanes)
    itemsize = jnp.dtype(x.dtype).itemsize
    sub = 32 if itemsize == 1 else (16 if itemsize == 2 else 8)

    compiler_params = pltpu.CompilerParams(
        dimension_semantics=("parallel", "parallel"))

    if W % _LANES == 0:
        # ---- layout A: direct NCHW tiling, zero host-side copies ----
        th = _pick_tile(H, max((tile_rows * _LANES) // W, 1), sub, B)
        grid = (B, pl.cdiv(H, th))
        out = pl.pallas_call(
            _fused_kernel,
            out_shape=jax.ShapeDtypeStruct((B, H, W), out_dtype),
            grid_spec=pltpu.PrefetchScalarGridSpec(
                num_scalar_prefetch=1,
                grid=grid,
                in_specs=[pl.BlockSpec((1, C, th, W), lambda bi, ti, p: (bi, 0, ti, 0))],
                out_specs=pl.BlockSpec((1, th, W), lambda bi, ti, p: (bi, ti, 0)),
            ),
            compiler_params=compiler_params,
        )(params, x)
        return out[None]                                   # (1, B, H, W)

    # ---- layout B: flattened lane-dense (rows, 128) spatial layout ----
    HW = H * W
    rows = pl.cdiv(HW, _LANES)
    x_flat = x.reshape(B, C, HW)
    if HW % _LANES != 0:                                   # lane padding only when needed
        x_flat = jnp.pad(x_flat, ((0, 0), (0, 0), (0, rows * _LANES - HW)))
    x_tiles = x_flat.reshape(B, C, rows, _LANES)

    tr = _pick_tile(rows, tile_rows, sub, B)
    grid = (B, pl.cdiv(rows, tr))                          # non-divisible grid: last block clamped

    out = pl.pallas_call(
        _fused_kernel,
        out_shape=jax.ShapeDtypeStruct((B, rows, _LANES), out_dtype),
        grid_spec=pltpu.PrefetchScalarGridSpec(
            num_scalar_prefetch=1,
            grid=grid,
            in_specs=[pl.BlockSpec((1, C, tr, _LANES), lambda bi, ti, p: (bi, 0, ti, 0))],
            out_specs=pl.BlockSpec((1, tr, _LANES), lambda bi, ti, p: (bi, ti, 0)),
        ),
        compiler_params=compiler_params,
    )(params, x_tiles)

    out_flat = out.reshape(B, rows * _LANES)
    if HW % _LANES != 0:
        out_flat = out_flat[:, :HW]                        # drop lane-padding tail only
    return out_flat.reshape(B, H, W)[None]                 # (1, B, H, W)


def _reference(x, mean, std, w, b):
    # plain-JAX reference of the same forward pass (un-folded arithmetic, NCHW)
    xf = x.astype(jnp.float32)
    xn = (xf / 255.0 - mean.reshape(1, -1, 1, 1)) / std.reshape(1, -1, 1, 1)
    out = jnp.einsum("oc,bchw->bohw", w, xn) + b.reshape(1, -1, 1, 1)
    return jax.nn.sigmoid(out[:, 0, :, :])[None]


if __name__ == "__main__":
    key = jax.random.PRNGKey(0)
    kx, kw, kb, kx2, kx3, kx4 = jax.random.split(key, 6)

    B, C_in, H, W = 2, 3, 16, 16
    C_out = 4

    # image-like input in [0, 255]
    x = jax.random.uniform(kx, (B, C_in, H, W), dtype=jnp.float32,
                           minval=0.0, maxval=255.0)

    # RGBNormalizeLayer parameters (standard ImageNet stats)
    mean = jnp.array([0.485, 0.456, 0.406], dtype=jnp.float32)
    std = jnp.array([0.229, 0.224, 0.225], dtype=jnp.float32)

    # deterministic synthetic "model": 1x1 Conv2d(C_in -> C_out)
    w = jax.random.normal(kw, (C_out, C_in), dtype=jnp.float32) * 0.5
    b = jax.random.normal(kb, (C_out,), dtype=jnp.float32) * 0.1

    # 1) basic f32, W not a multiple of 128 (lane-dense fallback layout)
    out = jax.block_until_ready(model_wrapper_line_segmentation(x, mean, std, w, b))
    ref = _reference(x, mean, std, w, b)
    assert out.shape == (1, B, H, W), out.shape
    assert jnp.allclose(out, ref, atol=1e-5, rtol=1e-5), \
        float(jnp.max(jnp.abs(out - ref)))

    # 2) odd spatial size (lane padding + non-divisible row grid, B == 1 split)
    x2 = jax.random.uniform(kx2, (1, C_in, 33, 70), dtype=jnp.float32,
                            minval=0.0, maxval=255.0)
    out2 = jax.block_until_ready(model_wrapper_line_segmentation(x2, mean, std, w, b))
    ref2 = _reference(x2, mean, std, w, b)
    assert out2.shape == (1, 1, 33, 70), out2.shape
    assert jnp.allclose(out2, ref2, atol=1e-5, rtol=1e-5), \
        float(jnp.max(jnp.abs(out2 - ref2)))

    # 3) W % 128 == 0 -> direct NCHW layout, partial last sublane block, B == 1 split
    x3 = jax.random.uniform(kx3, (1, C_in, 36, 128), dtype=jnp.float32,
                            minval=0.0, maxval=255.0)
    out3 = jax.block_until_ready(model_wrapper_line_segmentation(x3, mean, std, w, b))
    ref3 = _reference(x3, mean, std, w, b)
    assert out3.shape == (1, 1, 36, 128), out3.shape
    assert jnp.allclose(out3, ref3, atol=1e-5, rtol=1e-5), \
        float(jnp.max(jnp.abs(out3 - ref3)))

    # 4) uint8 input fed straight to the kernel (cast happens in-kernel)
    x4 = jax.random.randint(kx4, (1, C_in, 32, 128), 0, 256, dtype=jnp.int32).astype(jnp.uint8)
    out4 = jax.block_until_ready(model_wrapper_line_segmentation(x4, mean, std, w, b))
    ref4 = _reference(x4, mean, std, w, b)
    assert out4.shape == (1, 1, 32, 128), out4.shape
    assert jnp.allclose(out4, ref4, atol=1e-5, rtol=1e-5), \
        float(jnp.max(jnp.abs(out4 - ref4)))

    print("KERNEL_OK")
</pallas_src>

<mosaic_0001>
module attributes {stable_mosaic.version = 11 : i64} {
  func.func @_fused_kernel(%arg0: i32, %arg1: i32, %arg2: memref<4xf32, #tpu.memory_space<smem>>, %arg3: memref<1x3x2x128xf32, #tpu.memory_space<vmem>>, %arg4: memref<1x2x128xf32, #tpu.memory_space<vmem>>) attributes {dimension_semantics = [#tpu.dimension_semantics<parallel>, #tpu.dimension_semantics<parallel>], iteration_bounds = array<i64: 2, 1>, scalar_prefetch = 1 : i64, scratch_operands = 0 : i64, tpu.core_type = #tpu.core_type<tc>, window_params = [{transform_indices = @transform_0, window_bounds = array<i64: 1, 3, 2, 128>}, {transform_indices = @transform_1, window_bounds = array<i64: 1, 2, 128>}]} {
    %c0 = arith.constant 0 : index
    %c0_0 = arith.constant 0 : index
    %c0_1 = arith.constant 0 : index
    %c0_2 = arith.constant 0 : index
    %0 = vector.load %arg3[%c0, %c0_0, %c0_1, %c0_2] : memref<1x3x2x128xf32, #tpu.memory_space<vmem>>, vector<1x1x2x128xf32>
    %1 = vector.shape_cast %0 : vector<1x1x2x128xf32> to vector<2x128xf32>
    %c0_3 = arith.constant 0 : index
    %2 = memref.load %arg2[%c0_3] : memref<4xf32, #tpu.memory_space<smem>>
    %3 = vector.broadcast %2 : f32 to vector<2x128xf32>
    %4 = arith.mulf %1, %3 : vector<2x128xf32>
    %c3 = arith.constant 3 : index
    %5 = memref.load %arg2[%c3] : memref<4xf32, #tpu.memory_space<smem>>
    %6 = vector.broadcast %5 : f32 to vector<2x128xf32>
    %7 = arith.addf %4, %6 : vector<2x128xf32>
    %c0_4 = arith.constant 0 : index
    %c1 = arith.constant 1 : index
    %c0_5 = arith.constant 0 : index
    %c0_6 = arith.constant 0 : index
    %8 = vector.load %arg3[%c0_4, %c1, %c0_5, %c0_6] : memref<1x3x2x128xf32, #tpu.memory_space<vmem>>, vector<1x1x2x128xf32>
    %9 = vector.shape_cast %8 : vector<1x1x2x128xf32> to vector<2x128xf32>
    %c1_7 = arith.constant 1 : index
    %10 = memref.load %arg2[%c1_7] : memref<4xf32, #tpu.memory_space<smem>>
    %11 = vector.broadcast %10 : f32 to vector<2x128xf32>
    %12 = arith.mulf %9, %11 : vector<2x128xf32>
    %13 = arith.addf %7, %12 : vector<2x128xf32>
    %c0_8 = arith.constant 0 : index
    %c2 = arith.constant 2 : index
    %c0_9 = arith.constant 0 : index
    %c0_10 = arith.constant 0 : index
    %14 = vector.load %arg3[%c0_8, %c2, %c0_9, %c0_10] : memref<1x3x2x128xf32, #tpu.memory_space<vmem>>, vector<1x1x2x128xf32>
    %15 = vector.shape_cast %14 : vector<1x1x2x128xf32> to vector<2x128xf32>
    %c2_11 = arith.constant 2 : index
    %16 = memref.load %arg2[%c2_11] : memref<4xf32, #tpu.memory_space<smem>>
    %17 = vector.broadcast %16 : f32 to vector<2x128xf32>
    %18 = arith.mulf %15, %17 : vector<2x128xf32>
    %19 = arith.addf %13, %18 : vector<2x128xf32>
    %20 = arith.negf %19 : vector<2x128xf32>
    %21 = math.exp %20 : vector<2x128xf32>
    %cst = arith.constant 1.000000e+00 : f32
    %22 = vector.broadcast %cst : f32 to vector<2x128xf32>
    %23 = arith.addf %22, %21 : vector<2x128xf32>
    %24 = arith.divf %22, %23 : vector<2x128xf32>
    %c0_12 = arith.constant 0 : index
    %c0_13 = arith.constant 0 : index
    %c0_14 = arith.constant 0 : index
    %25 = vector.load %arg4[%c0_12, %c0_13, %c0_14] : memref<1x2x128xf32, #tpu.memory_space<vmem>>, vector<1x2x128xf32>
    %26 = vector.shape_cast %25 : vector<1x2x128xf32> to vector<2x128xf32>
    %27 = vector.shape_cast %24 : vector<2x128xf32> to vector<1x2x128xf32>
    tpu.vector_store %arg4[%c0_12, %c0_13, %c0_14], %27 {strides = array<i32>} : memref<1x2x128xf32, #tpu.memory_space<vmem>>, vector<1x2x128xf32>,
    return
  }
  func.func @transform_0(%arg0: i32, %arg1: i32, %arg2: memref<4xf32, #tpu.memory_space<smem>>) -> (i32, i32, i32, i32) {
    %c0_i32 = arith.constant 0 : i32
    %c0_i32_0 = arith.constant 0 : i32
    %c0_i32_1 = arith.constant 0 : i32
    return %arg0, %c0_i32, %arg1, %c0_i32_0 : i32, i32, i32, i32
  }
  func.func @transform_1(%arg0: i32, %arg1: i32, %arg2: memref<4xf32, #tpu.memory_space<smem>>) -> (i32, i32, i32) {
    %c0_i32 = arith.constant 0 : i32
    %c0_i32_0 = arith.constant 0 : i32
    return %arg0, %arg1, %c0_i32 : i32, i32, i32
  }
}

</mosaic_0001>

<bundles_post_ra>
// kernel: tpu_custom_call.1
= control target key start
LH: loop header
LB: loop body
LE: loop exit
PB: predicated region body
PF: predicated region fallthrough
CT: control target
= control target key end

     0   :  { %s700_s0 = inlined_call_operand.hbm [shape: f32[4], index: 0, kind: input, shape index: {}]   ;;  %s701_s1 = inlined_call_operand.hbm [shape: f32[2,3,2,128], index: 1, kind: input, shape index: {}]   ;;  %s702_s2 = inlined_call_operand.hbm [shape: f32[2,2,128], index: 2, kind: output, shape index: {}]  }
   0x1   :  { %s368_s11 = scalar_lea.hbm %s700_s0, 16 }
   0x2   :  { %p369_p0 = scmp.ne.s32.totalorder %s700_s0, %s368_s11  ;;  %p372_p1 = scmp.lt.u32.totalorder %s368_s11, %s700_s0 }
   0x4   :  { %p374_p2 = pnand %p372_p1, %p369_p0 }
   0x6   :  { %377 = shalt.err (!%p374_p2)  }
   0x7   :  { %s494_s16 = smov [#allocation3]  }
   0x8   :  { %8 = dma.hbm_to_smem %s700_s0, 16, %s494_s16, [#allocation2] }
   0x9   :  { %460 = dma.done.wait [#allocation2], 16 }
   0xa   :  { %461 = vsyncadd [#allocation2], 4294967280 }
   0xb   :  { %10 = sfence }
   0xc   :  { %11 = vsyncpa [#allocation5], 0 }
   0xd   :  { %13 = vsyncpa [#allocation5 + $0x1], 0 }
   0xe   :  { %14 = vsyncpa [#allocation6], 0 }
   0xf   :  { %16 = vsyncpa [#allocation6 + $0x1], 0  ;;  %s526_s19 = smov 0   ;;  %s528_s20 = smov 0  }
  0x10   :  { %s530_s21 = smov 0   ;;  %s532_s22 = smov 0  }
  0x11   :  { %s534_s23 = smov 0   ;;  %s536_s24 = smov 0  }
  0x12 LB: > { %s279_s0 = sadd.s32 4294967295, %s492_s24   ;;  %s280_s25 = sadd.s32 4294967294, %s492_s24   ;;  %s492_s24 = sphi %s536_s24, %s22_s24   ;;  %s488_s23 = sphi %s534_s23, %s717_s23   ;;  %s484_s22 = sphi %s532_s22, %s716_s22   ;;  %s480_s21 = sphi %s530_s21, %s715_s21   ;;  %s476_s20 = sphi %s528_s20, %s714_s20   ;;  %s472_s19 = sphi %s526_s19, %s713_s19  }
  0x13   : > { %s34_s26 = sadd.s32 1, %s488_s23  ;;  %s43_s27 = sadd.s32 1, %s480_s21 }
  0x14   : > { %p36_p3 = scmp.ge.s32.totalorder %s34_s26, 2  ;;  %p50_p4 = scmp.ne.s32.totalorder %s480_s21, %s476_s20 }
  0x15   : > { %p51_p5 = scmp.eq.s32.totalorder %s492_s24, 0  ;;  %p56_p6 = scmp.ne.s32.totalorder %s476_s20, %s472_s19 }
  0x16   : > { %s719_s26 = smov (%p36_p3, %s34_s26), 0  ;;  %p57_p8 = scmp.eq.s32.totalorder %s279_s0, 0 }
  0x17   : > { %p567_p7 = por %p51_p5, %p50_p4  ;;  %s38_s29 = ssub.s32 %s488_s23, %s719_s26 }
  0x18   : > { %p82_p9 = scmp.eq.s32.totalorder %s279_s0, 1  ;;  %p41_p10 = scmp.eq.s32.totalorder %s38_s29, 0 }
  0x19   : > { %p573_p11 = por %p57_p8, %p56_p6  ;;  %p88_p13 = scmp.eq.s32.totalorder %s280_s25, 1 }
  0x1a   : > { %p577_p12 = por %p82_p9, %p50_p4  ;;  %p311_p2 = scmp.lt.s32.totalorder %s492_s24, 2 }
  0x1b   : > { %s582_s4 = scalar_select %p41_p10, %s480_s21, %s43_s27  }
  0x1c   : > { %s706_s3 = scalar_select %p577_p12, 1, 0 }
  0x1d   : > { %p584_p0 = por %p88_p13, %p56_p6  ;;  %s108_s6 = sand.u32 1, %s480_s21  }
  0x1e   : > { %s296_s7 = smul.u32 6, %s108_s6  ;;  %p594_p3 = pnand %p311_p2, %p567_p7 }
  0x1f   : > { %s707_s5 = scalar_select %p584_p0, 1, 0 }
  0x20   : > { %s297_s8 = smul.u32 96, %s488_s23  ;;  %s112_s13 = scalar_lea.vmem [#allocation4], %s296_s7 }
  0x21   : > { %s120_s14 = sshll.u32 %s112_s13, 4  ;;  %s606_s15 = scalar_lea.sflag [#allocation5], %s108_s6  ;;  %s603_s14 = int_to_ptr.vmem [resolvable:$true] %s120_s14 }
  0x22   : > { %s601_s12 = scalar_lea.hbm %s701_s1, %s297_s8  ;;  %p380_p6 = pneg %p594_p3 }
  0x23   : > { %s378_s16 = scalar_lea.hbm %s601_s12, 96  ;;  %s383_s0 = scalar_lea.hbm %s701_s1, 192 }
  0x24   : > { %p379_p5 = scmp.ne.s32.totalorder %s601_s12, %s378_s16  ;;  %p384_p9 = scmp.lt.u32.totalorder %s601_s12, %s701_s1 }
  0x25   : > { %p385_p10 = scmp.lt.u32.totalorder %s383_s0, %s378_s16  ;;  %p387_p2 = scmp.lt.u32.totalorder %s378_s16, %s601_s12 }
  0x26   : > { %p381_p7 = pnand %p380_p6, %p379_p5 }
  0x27   : > { %p386_p13 = por %p385_p10, %p384_p9 }
  0x28   : > { %p382_p8 = pneg %p381_p7 }
  0x29   : > { %p388_p1 = por %p387_p2, %p386_p13 }
  0x2b   : > { %p389_p4 = pnand %p388_p1, %p382_p8 }
  0x2d   : > { %392 = shalt.err (!%p389_p4)
}
  0x2e   : > { %s393_s28 = scalar_lea.vmem %s603_s14, 96  ;;  %s495_s29 = smov [#allocation4]  }
  0x2f   : > { %p394_p5 = scmp.ne.s32.totalorder %s603_s14, %s393_s28  ;;  %s398_s6 = sshll.u32 %s495_s29, 4  ;;  %s399_s6 = int_to_ptr.vmem [resolvable:$false] %s398_s6 }
  0x30   : > { %s400_s7 = scalar_lea.vmem %s399_s6, 192  ;;  %p401_p12 = scmp.lt.s32.totalorder %s603_s14, %s399_s6 }
  0x31   : > { %p396_p7 = pnand %p394_p5, %p380_p6  ;;  %p402_p9 = scmp.lt.s32.totalorder %s400_s7, %s393_s28 }
  0x33   : > { %p397_p0 = pneg %p396_p7  ;;  %p403_p10 = por %p402_p9, %p401_p12 }
  0x35   : > { %p404_p13 = pnand %p403_p10, %p397_p0 }
  0x37   : > { %407 = shalt.err (!%p404_p13)
}
  0x38   : > { %s496_s8 = smov 32   ;;  %s497_s10 = smov 2  }
  0x39   : > { %306 = dma.hbm_to_vmem [thread:$0]  (!%p594_p3), %s601_s12, 96, %s603_s14, %s606_s15, %s496_s8, %s496_s8, %s497_s10  }
  0x3a   : > { %p128_p1 = scmp.lt.s32.totalorder %s492_s24, 3  ;;  %p709_p4 = scmp.ge.s32.totalorder %s492_s24, 1 }
  0x3c   : > { %p129_p6 = pnand %p709_p4, %p128_p1 }
  0x3d   : > { %s638_s11 = sand.u32 (!%p129_p6), 1, %s476_s20  }
  0x3e   : > { %132 = sbr.rel (%p129_p6) target bundleno = 125 (0x7d), region = 24  ;;  %s135_s16 = scalar_lea.sflag (!%p129_p6), [#allocation5], %s638_s11 }
  0x3f   : > { %s298_s13 = smul.u32 (!%p129_p6), 6, %s638_s11 }
  0x41   : > { %s138_s17 = scalar_lea.vmem (!%p129_p6), [#allocation4], %s298_s13 }
  0x45   : > { %463 = dma.done.wait (%p573_p11), %s135_s16, 96  }
  0x46   : > { %465 = vsyncadd (%p573_p11), %s135_s16, 4294967200  ;;  %s158_s9 = sld [smem:[#allocation3]]  ;;  %s286_s12 = sld [smem:[#allocation3 + $0x3]]  ;;  %v157_v0 = vld [vmem:[%s138_s17] sm:$0x3] }
  0x47   : > { %s288_s14 = sld [smem:[#allocation3 + $0x1]]  ;;  %s290_s15 = sld [smem:[#allocation3 + $0x2]]  ;;  %v287_v3 = vld [vmem:[%s138_s17 + $0x2] sm:$0x3]  ;;  %v289_v6 = vld [vmem:[%s138_s17 + $0x4] sm:$0x3] }
  0x48   : > { %s285_s30 = sshll.u32 %s638_s11, 1  ;;  %s293_s25 = sshll.u32 %s484_s22, 5 }
  0x49   : > { %s156_s18 = scalar_lea.vmem [#allocation7], %s285_s30  ;;  %s653_s29 = scalar_lea.hbm %s702_s2, %s293_s25 }
  0x4a   : > { %s198_s0 = sshll.u32 %s156_s18, 4  ;;  %s184_s6 = scalar_lea.sflag [#allocation6], %s638_s11  ;;  %s648_s0 = int_to_ptr.vmem [resolvable:$true] %s198_s0 }
  0x4b   : > { %s408_s7 = scalar_lea.vmem %s648_s0, 32  ;;  %p710_p12 = scmp.ne.s32.totalorder %s706_s3, 0 }
  0x4c   : > { %v159_v1 = vstv %s158_s9  ;;  %v162_v2 = vstv %s286_s12  ;;  %p409_p11 = scmp.ne.s32.totalorder %s648_s0, %s408_s7  ;;  %s498_s8 = smov [#allocation7]  }
  0x4d   : > { %v160_v4 = vmul.f32 %v159_v1, %v157_v0  ;;  %v167_v5 = vstv %s288_s14  ;;  %v173_v7 = vstv %s290_s15  ;;  %s412_s22 = sshll.u32 %s498_s8, 4  ;;  %s413_s22 = int_to_ptr.vmem [resolvable:$false] %s412_s22 }
  0x4e   : > { %v168_v8 = vmul.f32 %v287_v3, %v167_v5  ;;  %v174_v10 = vmul.f32 %v289_v6, %v173_v7  ;;  %p410_p0 = pnand %p409_p11, %p710_p12  ;;  %s414_s10 = scalar_lea.vmem %s413_s22, 64 }
  0x4f   : > { %v163_v9 = vadd.f32 %v162_v2, %v160_v4  ;;  %p415_p8 = scmp.lt.s32.totalorder %s648_s0, %s413_s22  ;;  %p416_p2 = scmp.lt.s32.totalorder %s414_s10, %s408_s7 }
  0x50   : > { %p411_p3 = pneg %p410_p0 }
  0x51   : > { %v169_v11 = vadd.f32 %v168_v8, %v163_v9  ;;  %p417_p5 = por %p416_p2, %p415_p8 }
  0x53   : > { %v175_v12 = vadd.f32 %v174_v10, %v169_v11  ;;  %p418_p7 = pnand %p417_p5, %p411_p3 }
  0x55   : > { %v291_v13 = vmul.f32 -1.442695, %v175_v12 }
  0x57   : > { %364 = vpow2.f32 %v291_v13 }
  0x61   : > { %v365_v14 = vpop.eup %364 }
  0x62   : > { %v179_v15 = vadd.f32 1.0, %v365_v14 }
  0x64   : > { %366 = vrcp.f32 %v179_v15 }
  0x6e   : > { %v367_v16 = vpop.eup %366 }
  0x6f   : > { %182 = vst [vmem:[%s156_s18] sm:$0x3] %v367_v16 }
  0x70   : > { %421 = shalt.err (!%p418_p7)
}
  0x71   : > { %s422_s11 = scalar_lea.hbm %s653_s29, 32  ;;  %s426_s17 = scalar_lea.hbm %s702_s2, 64 }
  0x72   : > { %p423_p9 = scmp.ne.s32.totalorder %s653_s29, %s422_s11  ;;  %p427_p1 = scmp.lt.u32.totalorder %s653_s29, %s702_s2 }
  0x73   : > { %p428_p4 = scmp.lt.u32.totalorder %s426_s17, %s422_s11  ;;  %p430_p11 = scmp.lt.u32.totalorder %s422_s11, %s653_s29 }
  0x74   : > { %p424_p10 = pnand %p423_p9, %p710_p12 }
  0x75   : > { %p429_p6 = por %p428_p4, %p427_p1 }
  0x76   : > { %p425_p13 = pneg %p424_p10 }
  0x77   : > { %p431_p0 = por %p430_p11, %p429_p6 }
  0x79   : > { %p432_p3 = pnand %p431_p0, %p425_p13 }
  0x7b   : > { %435 = shalt.err (!%p432_p3)
}
  0x7c   : > { %301 = dma.vmem_to_hbm [thread:$0]  (%p710_p12), %s648_s0, 32, %s653_s29, %s184_s6  }
  0x7d PF: > { %s210_s14 = sand.u32 1, %s472_s19   ;;  %p711_p8 = scmp.ne.s32.totalorder %s707_s5, 0 }
  0x7e   : > { %p712_p2 = scmp.ge.s32.totalorder %s492_s24, 2  ;;  %s211_s15 = scalar_lea.sflag [#allocation6], %s210_s14 }
  0x80   : > { %p308_p5 = pnand %p712_p2, %p711_p8 }
  0x82   : > { %467 = dma.done.wait (!%p308_p5), %s211_s15, 32  }
  0x83   : > { %469 = vsyncadd (!%p308_p5), %s211_s15, 4294967264  ;;  %s22_s24 = sadd.s32 1, %s492_s24   ;;  %s713_s19 = smov %s476_s20 }
  0x84   : > { %p19_p7 = scmp.ge.s32.totalorder %s22_s24, 4   ;;  %s714_s20 = smov %s480_s21 }
  0x85   : > { %s715_s21 = smov %s582_s4  ;;  %s716_s22 = smov %s488_s23 }
  0x86   : > { %s717_s23 = smov %s719_s26  ;;  %21 = sbr.rel (!%p19_p7) target bundleno = 18 (0x12), region = 71 }
  0x8d   :  { %216 = vsyncpa [#allocation5], 1 }
  0x8e   :  { %218 = vsyncpa [#allocation5 + $0x1], 1 }
  0x8f   :  { %219 = vsyncpa [#allocation6], 1 }
  0x90   :  { %221 = vsyncpa [#allocation6 + $0x1], 1 }

</bundles_post_ra>
